<compile_context>
chip_gen: v7x
topology: tpu7x:2x2x1
jax: 0.10.0
libtpu: 0.0.40
codegen_flags: <defaults>
</compile_context>

<pallas_src>
import math

import jax
import jax.numpy as jnp
from jax.experimental import pallas as pl
from jax.experimental.pallas import tpu as pltpu


_SLAB_LANES = 128  # lane-dense packed-parameter slab width


def _slab_layout(n_in: int, n_mid: int, n_out: int):
    """Static row offsets of each parameter inside the packed slab."""
    r_w1 = 0                      # [n_in,  n_mid]
    r_b1 = r_w1 + n_in            # [1,     n_mid]
    r_w2 = r_b1 + 1               # [n_mid, n_mid]
    r_b2 = r_w2 + n_mid           # [1,     n_mid]
    r_wh = r_b2 + 1               # [n_mid, 1 + n_out]   (critic col | actor cols)
    r_bh = r_wh + n_mid           # [1,     1 + n_out]
    rows = r_bh + 1
    rows_padded = ((rows + 7) // 8) * 8
    return dict(w1=r_w1, b1=r_b1, w2=r_w2, b2=r_b2, wh=r_wh, bh=r_bh,
                rows=rows_padded)


def prepare_params(params):
    """One-time conversion of PyTorch-convention params into ONE packed slab.

    Input (PyTorch layout):
        w1 [n_mid, n_in],  b1 [n_mid]
        w2 [n_mid, n_mid], b2 [n_mid]
        wa [n_out, n_mid], ba [n_out]
        wc [1, n_mid],     bc [1]
    Output: f32 slab [rows_padded, 128] with every param (already transposed
    to [in, out] layout and head-fused) at a static row offset, column 0.
    """
    w1_t = jnp.asarray(params["w1"], jnp.float32)
    n_mid, n_in = w1_t.shape
    n_out = jnp.asarray(params["wa"]).shape[0]
    n_head = 1 + n_out
    lay = _slab_layout(n_in, n_mid, n_out)

    w1 = w1_t.T                                                   # [n_in,  n_mid]
    b1 = jnp.asarray(params["b1"], jnp.float32).reshape(1, n_mid)
    w2 = jnp.asarray(params["w2"], jnp.float32).T                 # [n_mid, n_mid]
    b2 = jnp.asarray(params["b2"], jnp.float32).reshape(1, n_mid)
    # critic column first, then actor columns
    wh = jnp.concatenate(
        [jnp.asarray(params["wc"], jnp.float32).T,
         jnp.asarray(params["wa"], jnp.float32).T], axis=1)       # [n_mid, n_head]
    bh = jnp.concatenate(
        [jnp.asarray(params["bc"], jnp.float32),
         jnp.asarray(params["ba"], jnp.float32)]).reshape(1, n_head)

    slab = jnp.zeros((lay["rows"], _SLAB_LANES), jnp.float32)
    slab = slab.at[lay["w1"]:lay["w1"] + n_in,  :n_mid].set(w1)
    slab = slab.at[lay["b1"]:lay["b1"] + 1,     :n_mid].set(b1)
    slab = slab.at[lay["w2"]:lay["w2"] + n_mid, :n_mid].set(w2)
    slab = slab.at[lay["b2"]:lay["b2"] + 1,     :n_mid].set(b2)
    slab = slab.at[lay["wh"]:lay["wh"] + n_mid, :n_head].set(wh)
    slab = slab.at[lay["bh"]:lay["bh"] + 1,     :n_head].set(bh)
    return slab


def _make_kernel(n_in: int, n_mid: int, n_out: int, lay):
    n_head = 1 + n_out

    def kernel(x_ref, p_ref, critic_ref, actor_ref):
        x = x_ref[...]

        # Static slab carve-outs (all start at column 0 of the lane-dense slab).
        w1 = p_ref[lay["w1"]:lay["w1"] + n_in,  0:n_mid]
        b1 = p_ref[lay["b1"]:lay["b1"] + 1,     0:n_mid]
        w2 = p_ref[lay["w2"]:lay["w2"] + n_mid, 0:n_mid]
        b2 = p_ref[lay["b2"]:lay["b2"] + 1,     0:n_mid]
        wh = p_ref[lay["wh"]:lay["wh"] + n_mid, 0:n_head]
        bh = p_ref[lay["bh"]:lay["bh"] + 1,     0:n_head]

        # fc1 + relu
        h1 = jnp.dot(x, w1, preferred_element_type=jnp.float32) + b1
        h1 = jnp.maximum(h1, 0.0)

        # fc2 + relu
        h2 = jnp.dot(h1, w2, preferred_element_type=jnp.float32) + b2
        h2 = jnp.maximum(h2, 0.0)

        # fused heads: one MXU matmul -> [B, 1 + n_out], split into two outputs
        out = jnp.dot(h2, wh, preferred_element_type=jnp.float32) + bh
        critic_ref[...] = out[:, 0:1].astype(critic_ref.dtype)
        actor_ref[...] = out[:, 1:n_head].astype(actor_ref.dtype)

    return kernel


def make_net_forward(n_in: int, n_mid: int, n_out: int):
    """Build a jitted forward: (x [B, n_in], slab) -> (critic [B,1], actor [B,n_out])."""
    lay = _slab_layout(n_in, n_mid, n_out)
    kernel = _make_kernel(n_in, n_mid, n_out, lay)
    vmem = pl.BlockSpec(memory_space=pltpu.MemorySpace.VMEM)

    def fwd(x, slab):
        B = x.shape[0]
        critic, actor = pl.pallas_call(
            kernel,
            out_shape=(jax.ShapeDtypeStruct((B, 1), jnp.float32),
                       jax.ShapeDtypeStruct((B, n_out), jnp.float32)),
            in_specs=[vmem, vmem],
            out_specs=(vmem, vmem),
        )(x, slab)
        return critic, actor

    # NOTE: in a real A2C loop, inline this into the larger jitted rollout /
    # update step and batch env states (vmap) to amortize the launch cost.
    return jax.jit(fwd)


def init_params(key, n_in, n_mid, n_out):
    """Deterministic init mimicking nn.Linear default (U(-1/sqrt(fan_in), +))."""
    ks = jax.random.split(key, 8)

    def lin(kw, kb, fan_in, fan_out):
        bound = 1.0 / math.sqrt(fan_in)
        w = jax.random.uniform(kw, (fan_out, fan_in), jnp.float32, -bound, bound)
        b = jax.random.uniform(kb, (fan_out,), jnp.float32, -bound, bound)
        return w, b

    w1, b1 = lin(ks[0], ks[1], n_in, n_mid)
    w2, b2 = lin(ks[2], ks[3], n_mid, n_mid)
    wa, ba = lin(ks[4], ks[5], n_mid, n_out)
    wc, bc = lin(ks[6], ks[7], n_mid, 1)
    return {"w1": w1, "b1": b1, "w2": w2, "b2": b2,
            "wa": wa, "ba": ba, "wc": wc, "bc": bc}


def net_forward_ref(x, p):
    """Pure-JAX reference, matching PyTorch semantics exactly."""
    h1 = jax.nn.relu(x @ p["w1"].T + p["b1"])
    h2 = jax.nn.relu(h1 @ p["w2"].T + p["b2"])
    critic = h2 @ p["wc"].T + p["bc"]
    actor = h2 @ p["wa"].T + p["ba"]
    return critic, actor


if __name__ == "__main__":
    # CartPole-like A2C net: n_in=4 (state), n_mid=32, n_out=2 (actions), batch=8
    B, N_IN, N_MID, N_OUT = 8, 4, 32, 2

    key = jax.random.PRNGKey(0)
    kx, kp = jax.random.split(key)
    x = jax.random.normal(kx, (B, N_IN), dtype=jnp.float32)
    params = init_params(kp, N_IN, N_MID, N_OUT)

    # One-time layout prep (single packed slab) + forward builder.
    slab = prepare_params(params)
    net_forward = make_net_forward(N_IN, N_MID, N_OUT)

    critic, actor = net_forward(x, slab)
    critic = jax.block_until_ready(critic)
    actor = jax.block_until_ready(actor)

    critic_ref, actor_ref = net_forward_ref(x, params)
    assert critic.shape == (B, 1) and actor.shape == (B, N_OUT)
    assert jnp.allclose(critic, critic_ref, atol=1e-5, rtol=1e-5)
    assert jnp.allclose(actor, actor_ref, atol=1e-5, rtol=1e-5)

    # TODO(synk): act()/evaluate_actions() (softmax, multinomial sampling,
    # entropy) are consumer-side policy logic, intentionally left to plain JAX.

    print("KERNEL_OK")
</pallas_src>

<mosaic_0001>
module attributes {stable_mosaic.version = 11 : i64} {
  func.func @kernel(%arg0: memref<8x4xf32, #tpu.memory_space<vmem>>, %arg1: memref<72x128xf32, #tpu.memory_space<vmem>>, %arg2: memref<8x1xf32, #tpu.memory_space<vmem>>, %arg3: memref<8x2xf32, #tpu.memory_space<vmem>>) attributes {dimension_semantics = [], scalar_prefetch = 0 : i64, scratch_operands = 0 : i64, tpu.core_type = #tpu.core_type<tc>} {
    %c0 = arith.constant 0 : index
    %c0_0 = arith.constant 0 : index
    %0 = vector.load %arg0[%c0, %c0_0] : memref<8x4xf32, #tpu.memory_space<vmem>>, vector<8x4xf32>
    %c0_1 = arith.constant 0 : index
    %c0_2 = arith.constant 0 : index
    %1 = vector.load %arg1[%c0_1, %c0_2] : memref<72x128xf32, #tpu.memory_space<vmem>>, vector<4x32xf32>
    %c4 = arith.constant 4 : index
    %c0_3 = arith.constant 0 : index
    %2 = vector.load %arg1[%c4, %c0_3] : memref<72x128xf32, #tpu.memory_space<vmem>>, vector<1x32xf32>
    %c5 = arith.constant 5 : index
    %c0_4 = arith.constant 0 : index
    %3 = vector.load %arg1[%c5, %c0_4] : memref<72x128xf32, #tpu.memory_space<vmem>>, vector<32x32xf32>
    %c37 = arith.constant 37 : index
    %c0_5 = arith.constant 0 : index
    %4 = vector.load %arg1[%c37, %c0_5] : memref<72x128xf32, #tpu.memory_space<vmem>>, vector<1x32xf32>
    %c38 = arith.constant 38 : index
    %c0_6 = arith.constant 0 : index
    %5 = vector.load %arg1[%c38, %c0_6] : memref<72x128xf32, #tpu.memory_space<vmem>>, vector<32x3xf32>
    %c70 = arith.constant 70 : index
    %c0_7 = arith.constant 0 : index
    %6 = vector.load %arg1[%c70, %c0_7] : memref<72x128xf32, #tpu.memory_space<vmem>>, vector<1x3xf32>
    %cst = arith.constant dense<0.000000e+00> : vector<8x32xf32>
    %7 = tpu.matmul %0, %1, %cst {dimension_numbers = #tpu.dot_dimension_numbers<[1], [0], [0], [1], [0, 0, 1, 1], [], []>} : vector<8x4xf32>, vector<4x32xf32>, vector<8x32xf32> -> vector<8x32xf32>
    %8 = vector.broadcast %2 : vector<1x32xf32> to vector<8x32xf32>
    %9 = arith.addf %7, %8 : vector<8x32xf32>
    %cst_8 = arith.constant 0.000000e+00 : f32
    %10 = vector.broadcast %cst_8 : f32 to vector<8x32xf32>
    %11 = arith.maximumf %9, %10 : vector<8x32xf32>
    %cst_9 = arith.constant dense<0.000000e+00> : vector<8x32xf32>
    %12 = tpu.matmul %11, %3, %cst_9 {dimension_numbers = #tpu.dot_dimension_numbers<[1], [0], [0], [1], [0, 0, 1, 1], [], []>} : vector<8x32xf32>, vector<32x32xf32>, vector<8x32xf32> -> vector<8x32xf32>
    %13 = vector.broadcast %4 : vector<1x32xf32> to vector<8x32xf32>
    %14 = arith.addf %12, %13 : vector<8x32xf32>
    %cst_10 = arith.constant 0.000000e+00 : f32
    %15 = vector.broadcast %cst_10 : f32 to vector<8x32xf32>
    %16 = arith.maximumf %14, %15 : vector<8x32xf32>
    %cst_11 = arith.constant dense<0.000000e+00> : vector<8x3xf32>
    %17 = tpu.matmul %16, %5, %cst_11 {dimension_numbers = #tpu.dot_dimension_numbers<[1], [0], [0], [1], [0, 0, 1, 1], [], []>} : vector<8x32xf32>, vector<32x3xf32>, vector<8x3xf32> -> vector<8x3xf32>
    %18 = vector.broadcast %6 : vector<1x3xf32> to vector<8x3xf32>
    %19 = arith.addf %17, %18 : vector<8x3xf32>
    %20 = vector.extract_strided_slice %19 {offsets = [0, 0], sizes = [8, 1], strides = [1, 1]} : vector<8x3xf32> to vector<8x1xf32>
    %c0_12 = arith.constant 0 : index
    %c0_13 = arith.constant 0 : index
    %21 = vector.load %arg2[%c0_12, %c0_13] : memref<8x1xf32, #tpu.memory_space<vmem>>, vector<8x1xf32>
    tpu.vector_store %arg2[%c0_12, %c0_13], %20 {strides = array<i32>} : memref<8x1xf32, #tpu.memory_space<vmem>>, vector<8x1xf32>,
    %22 = vector.extract_strided_slice %19 {offsets = [0, 1], sizes = [8, 2], strides = [1, 1]} : vector<8x3xf32> to vector<8x2xf32>
    %c0_14 = arith.constant 0 : index
    %c0_15 = arith.constant 0 : index
    %23 = vector.load %arg3[%c0_14, %c0_15] : memref<8x2xf32, #tpu.memory_space<vmem>>, vector<8x2xf32>
    tpu.vector_store %arg3[%c0_14, %c0_15], %22 {strides = array<i32>} : memref<8x2xf32, #tpu.memory_space<vmem>>, vector<8x2xf32>,
    return
  }
}

</mosaic_0001>

<bundles_post_ra>
// kernel: fwd.1
= control target key start
LH: loop header
LB: loop body
LE: loop exit
PB: predicated region body
PF: predicated region fallthrough
CT: control target
= control target key end

     0   :  { %9 = vsyncpa [#allocation3], 0  ;;  %s385_s12 = smov [#allocation2]   ;;  %s433_s0 = inlined_call_operand.vmem [shape: f32[8,4], index: 0, kind: input, shape index: {}]   ;;  %s434_s1 = inlined_call_operand.hbm [shape: f32[72,128], index: 1, kind: input, shape index: {}]   ;;  %s435_s2 = inlined_call_operand.vmem [shape: f32[8,1], index: 2, kind: output, shape index: {0}]   ;;  %s436_s3 = inlined_call_operand.vmem [shape: f32[8,2], index: 3, kind: output, shape index: {1}]  }
   0x1   :  { %s17_s13 = sshll.u32 %s385_s12, 4  ;;  %s361_s16 = scalar_lea.hbm %s434_s1, 1152  ;;  %s18_s13 = int_to_ptr.vmem [resolvable:$true] %s17_s13 }
   0x2   :  { %p362_p0 = scmp.ne.s32.totalorder %s434_s1, %s361_s16  ;;  %p365_p1 = scmp.lt.u32.totalorder %s361_s16, %s434_s1 }
   0x4   :  { %p367_p2 = pnand %p365_p1, %p362_p0 }
   0x6   :  { %370 = shalt.err (!%p367_p2)
}
   0x7   :  { %s371_s21 = scalar_lea.vmem %s18_s13, 1152  ;;  %p376_p4 = scmp.lt.s32.totalorder %s18_s13, %s18_s13 }
   0x8   :  { %p372_p3 = scmp.ne.s32.totalorder %s18_s13, %s371_s21  ;;  %p377_p5 = scmp.lt.s32.totalorder %s371_s21, %s371_s21 }
   0xa   :  { %p378_p6 = por %p377_p5, %p376_p4 }
   0xc   :  { %p379_p7 = pnand %p378_p6, %p372_p3 }
   0xe   :  { %382 = shalt.err (!%p379_p7)
}
   0xf   :  { %s386_s22 = smov 128   ;;  %s387_s23 = smov 8  }
  0x10   :  { %23 = dma.hbm_to_vmem [thread:$0]  %s434_s1, 1152, %s18_s13, [#allocation3], %s386_s22, %s386_s22, %s387_s23  }
  0x11   :  { %383 = dma.done.wait [#allocation3], 1152  }
  0x12   :  { %384 = vsyncadd [#allocation3], 4294966144  ;;  %v388_v0 = vmov 0.0   ;;  %vm389_vm0 = vmmov 0   ;;  %v390_v1 = vmov 0.0|0.0   ;;  %vm48_vm1 = vcmask 1043456  }
  0x13   :  { %315 = vmatprep.subr.mxu0 %v388_v0  ;;  %317 = vmatprep.mubr.msk.f32.mxu0 %vm389_vm0, %v388_v0  ;;  %vm44_vm2 = vcmask 31744   ;;  %v28_v2 = vld [vmem:[#allocation2] sm:$0xf]  ;;  %v30_v4 = vld [vmem:[#allocation2 + $0x5] sm:$0xff]  ;;  %v31_v5 = vld [vmem:[#allocation2 + $0xd] sm:$0xff]  ;;  %vm127_vm3 = vcmask 261120  }
  0x14   :  { %342 = vmatprep.subr.bf16.mxu1 %v390_v1  ;;  %328 = vmatprep.mubr.msk.f32.mxu1 %vm389_vm0, %v388_v0  ;;  %v27_v3 = vld [vmem:[%s433_s0] sm:$0xff]  ;;  %v343_v6 = vpack.c.bf16 %v31_v5, %v30_v4  ;;  %v32_v7 = vld [vmem:[#allocation2 + $0x15] sm:$0xff]  ;;  %vm279_vm4 = vcmask 7168   ;;  %s391_s28 = smov 127   ;;  %vm285_vm5 = vcmask 15360  }
  0x15   :  { %316 = vmatpush3.msk.msra.mxu0 %vm48_vm1, %v28_v2  ;;  %v33_v8 = vld [vmem:[#allocation2 + $0x1d] sm:$0xff]  ;;  %v35_v10 = vld [vmem:[#allocation2 + $0x26] sm:$0xff]  ;;  %v36_v11 = vld [vmem:[#allocation2 + $0x2e] sm:$0xff] }
  0x16   :  { %318 = vmatmul.mubr.msk.f32.vlgmr.msra.gmra.mrb[0].mxu0 %vm44_vm2, %v27_v3  ;;  %348 = vmatprep.subr.bf16.mxu0 %v390_v1  ;;  %v346_v9 = vpack.c.bf16 %v33_v8, %v32_v7  ;;  %v349_v12 = vpack.c.bf16 %v36_v11, %v35_v10  ;;  %v296_v13 = vld [vmem:[#allocation2 + $0x4] ss:$0 sm:$0xff]  ;;  %v37_v18 = vld [vmem:[#allocation2 + $0x36] sm:$0xff]  ;;  %v299_v21 = vld [vmem:[#allocation2 + $0x25] ss:$0 sm:$0xff] }
  0x17   :  { %339 = vmatprep.mubr.msk.f32.mxu0 %vm389_vm0, %v388_v0  ;;  %344 = vmatpush3.bf16.msra.mxu1 %v343_v6  ;;  %v38_v19 = vld [vmem:[#allocation2 + $0x3e] sm:$0xff]  ;;  %v301_v26 = vld [vmem:[#allocation2 + $0x46] ss:$0 sm:$0xff] }
  0x18   :  { %345 = vmatprep.subr.bf16.mxu1 %v390_v1  ;;  %350 = vmatpush3.bf16.msra.mxu0 %v349_v12  ;;  %v352_v20 = vpack.c.bf16 %v38_v19, %v37_v18 }
  0x19   :  { %351 = vmatprep.subr.bf16.mxu0 %v390_v1 }
  0x1b   :  { %347 = vmatpush3.bf16.msra.mxu1 %v346_v9 }
  0x1c   :  { %353 = vmatpush3.bf16.msra.mxu0 %v352_v20 }
  0xe9   :  { %v118_v14 = vpop.f32.mrb[0].mxu0 }
  0xea   :  { %v119_v15 = vadd.f32 %v296_v13, %v118_v14  ;;  %v319_v16 = vpop.f32.mrb[1].mxu0 }
  0xec   :  { %v122_v17 = vmax.f32 %v119_v15, 0.0 }
  0xee   :  { %329 = vmatmul.mubr.msk.f32.vlgmr.msra.gmra.mrb[0].mxu1 %vm127_vm3, %v122_v17 }
 0x1c1   :  { %v197_v22 = vpop.f32.mrb[0].mxu1 }
 0x1c2   :  { %v198_v23 = vadd.f32 %v299_v21, %v197_v22  ;;  %v330_v24 = vpop.f32.mrb[1].mxu1 }
 0x1c4   :  { %v201_v25 = vmax.f32 %v198_v23, 0.0 }
 0x1c6   :  { %340 = vmatmul.mubr.msk.f32.vlgmr.msra.gmra.mrb[2].mxu0 %vm127_vm3, %v201_v25 }
 0x299   :  { %v275_v27 = vpop.f32.mrb[2].mxu0 }
 0x29a   :  { %v276_v28 = vadd.f32 %v301_v26, %v275_v27  ;;  %v341_v29 = vpop.f32.mrb[3].mxu0 }
 0x29c   :  { %280 = vst.msk [vmem:[%s435_s2] sm:$0xff] %vm279_vm4, %v276_v28  ;;  %282 = vrot.lane.b32.xlu0 %v276_v28, %s391_s28 }
 0x30e   :  { %v283_v30 = vpop.permute.xlu0 %282 }
 0x30f   :  { %286 = vst.msk [vmem:[%s436_s3] sm:$0xff] %vm285_vm5, %v283_v30 }
 0x310   :  { %295 = vsyncpa [#allocation3], 1 }

</bundles_post_ra>
